<compile_context>
chip_gen: v7x
topology: tpu7x:2x2x1
jax: 0.10.0
libtpu: 0.0.40
codegen_flags: <defaults>
</compile_context>

<pallas_src>
import functools

import jax
import jax.numpy as jnp
from jax.experimental import pallas as pl
from jax.experimental.pallas import tpu as pltpu


def dwconv3x3_kernel(x_ref, w_ref, b_ref, m_ref, o_ref, *, W, HWp):
    # x_ref: (g_blk, HWp)  flattened, lane-dense image rows (padded tail ignored)
    # w_ref: (g_blk, 9)    per-channel 3x3 taps, row-major k = i*3 + j
    # b_ref: (g_blk, 1)    per-channel bias
    # m_ref: (4, HWp) f32  validity masks: [row h-1 ok, row h+1 ok, col w-1 ok, col w+1 ok]
    # o_ref: (g_blk, HWp)
    f32 = jnp.float32
    x = x_ref[...].astype(f32)                            # (g_blk, HWp)

    row_top = m_ref[0:1, :]                               # 1.0 where source row h-1 exists
    row_bot = m_ref[1:2, :]                               # 1.0 where source row h+1 exists
    col_l = m_ref[2:3, :]                                 # 1.0 where source col w-1 exists
    col_r = m_ref[3:4, :]                                 # 1.0 where source col w+1 exists

    # Row-shifted windows (value of the pixel one image row above / below).
    # Circular wrap lands only on rows that the masks zero out (or in the
    # cropped lane-padding tail), so a plain roll is exact.
    a_m1 = pltpu.roll(x, W, axis=1) * row_top             # x[h-1, w]
    a_0 = x                                               # x[h,   w]
    a_p1 = pltpu.roll(x, HWp - W, axis=1) * row_bot       # x[h+1, w]

    def tap(k):
        return w_ref[:, k:k + 1].astype(f32)              # (g_blk, 1), lane-broadcast

    # Weighted row combinations, grouped by kernel column j (one mask per side).
    left = tap(0) * a_m1 + tap(3) * a_0 + tap(6) * a_p1   # taps reading col w-1
    cent = tap(1) * a_m1 + tap(4) * a_0 + tap(7) * a_p1   # taps reading col w
    right = tap(2) * a_m1 + tap(5) * a_0 + tap(8) * a_p1  # taps reading col w+1

    acc = b_ref[...].astype(f32) + cent
    acc = acc + col_l * pltpu.roll(left, 1, axis=1)        # align col w-1 reads to col w
    acc = acc + col_r * pltpu.roll(right, HWp - 1, axis=1)  # align col w+1 reads to col w

    o_ref[...] = acc.astype(o_ref.dtype)


def depthwise_conv2d(x_nchw, weight_oihw, bias):
    """x_nchw: (N, C, H, W); weight_oihw: (C, 1, 3, 3) (PyTorch layout); bias: (C,)."""
    N, C, H, W = x_nchw.shape
    HW = H * W
    HWp = ((HW + 127) // 128) * 128          # lane-dense output -> unmasked vst
    G = N * C                                # fold batch into the sublane axis
    dtype = x_nchw.dtype
    itemsize = jnp.dtype(dtype).itemsize

    # Free (view) reshape; lane padding only if H*W is not a multiple of 128.
    x_flat = x_nchw.reshape(G, HW)
    if HWp != HW:
        x_flat = jnp.pad(x_flat, ((0, 0), (0, HWp - HW)))

    w_flat = jnp.tile(weight_oihw.reshape(C, 9), (N, 1)).astype(dtype)   # (G, 9)
    b_col = jnp.tile(bias.reshape(C, 1), (N, 1)).astype(dtype)           # (G, 1)

    # Hoisted border-validity masks (computed once, tiny, VMEM-resident per step).
    p = jnp.arange(HWp, dtype=jnp.int32)
    row = p // W
    col = p % W
    masks = jnp.stack([row > 0, row < H - 1, col > 0, col < W - 1]).astype(jnp.float32)

    # Sublane tile: <=32 rows for f32 (<=64 for bf16) so the unrolled tap chain
    # does not spill vregs; fall back to the full (small) G otherwise.
    cands = (64, 32, 16) if dtype == jnp.bfloat16 else (32, 16, 8)
    g_blk = next((c for c in cands if G % c == 0), G)
    # TODO(synk): for large H*W additionally tile H into row strips (1-row halo,
    # strip_rows*W a multiple of 128) so double-buffered blocks stay inside
    # v7x's 64 MiB VMEM.

    est_vmem = 4 * g_blk * HWp * itemsize + 4 * HWp * 4 + 2 * g_blk * 10 * itemsize
    cp_kwargs = dict(dimension_semantics=("parallel",))
    if est_vmem > 12 * 2**20:
        cp_kwargs["vmem_limit_bytes"] = int(min(96 * 2**20, 2 * est_vmem))

    kernel = functools.partial(dwconv3x3_kernel, W=W, HWp=HWp)

    out_flat = pl.pallas_call(
        kernel,
        out_shape=jax.ShapeDtypeStruct((G, HWp), dtype),
        grid=(G // g_blk,),
        in_specs=[
            pl.BlockSpec((g_blk, HWp), lambda g: (g, 0)),
            pl.BlockSpec((g_blk, 9), lambda g: (g, 0)),
            pl.BlockSpec((g_blk, 1), lambda g: (g, 0)),
            pl.BlockSpec((4, HWp), lambda g: (0, 0)),
        ],
        out_specs=pl.BlockSpec((g_blk, HWp), lambda g: (g, 0)),
        compiler_params=pltpu.CompilerParams(**cp_kwargs),
        cost_estimate=pl.CostEstimate(
            flops=18 * N * C * H * W,
            bytes_accessed=2 * G * HW * itemsize,
            transcendentals=0),
    )(x_flat, w_flat, b_col, masks)

    return out_flat[:, :HW].reshape(N, C, H, W)


if __name__ == "__main__":
    key = jax.random.PRNGKey(0)
    k_x, k_w, k_b = jax.random.split(key, 3)

    N, C, H, W = 2, 4, 16, 16
    x = jax.random.normal(k_x, (N, C, H, W), dtype=jnp.float32)

    # Same parameter shapes as nn.Conv2d(C, C, 3, padding=1, groups=C):
    # weight (C, 1, 3, 3), bias (C,), PyTorch-style uniform(-1/sqrt(fan_in), ...).
    fan_in = 1 * 3 * 3
    bound = 1.0 / (fan_in ** 0.5)
    weight = jax.random.uniform(k_w, (C, 1, 3, 3), jnp.float32, -bound, bound)
    bias = jax.random.uniform(k_b, (C,), jnp.float32, -bound, bound)

    out = depthwise_conv2d(x, weight, bias)
    out = jax.block_until_ready(out)

    # Reference: XLA grouped conv (NCHW, groups=C).
    ref = jax.lax.conv_general_dilated(
        x, weight,
        window_strides=(1, 1),
        padding=((1, 1), (1, 1)),
        dimension_numbers=("NCHW", "OIHW", "NCHW"),
        feature_group_count=C,
    ) + bias[None, :, None, None]

    assert out.shape == (N, C, H, W)
    assert jnp.allclose(out, ref, atol=1e-5, rtol=1e-5), "mismatch vs reference conv"
    print("KERNEL_OK")
</pallas_src>

<mosaic_0001>
module attributes {stable_mosaic.version = 11 : i64} {
  func.func @dwconv3x3_kernel(%arg0: i32, %arg1: memref<8x256xf32, #tpu.memory_space<vmem>>, %arg2: memref<8x9xf32, #tpu.memory_space<vmem>>, %arg3: memref<8x1xf32, #tpu.memory_space<vmem>>, %arg4: memref<4x256xf32, #tpu.memory_space<vmem>>, %arg5: memref<8x256xf32, #tpu.memory_space<vmem>>) attributes {dimension_semantics = [#tpu.dimension_semantics<parallel>], iteration_bounds = array<i64: 1>, scalar_prefetch = 0 : i64, scratch_operands = 0 : i64, tpu.core_type = #tpu.core_type<tc>, window_params = [{transform_indices = @transform_0, window_bounds = array<i64: 8, 256>}, {transform_indices = @transform_1, window_bounds = array<i64: 8, 9>}, {transform_indices = @transform_2, window_bounds = array<i64: 8, 1>}, {pipeline_mode = #tpu.pipeline_mode<synchronous>, transform_indices = @transform_3, window_bounds = array<i64: 4, 256>}, {transform_indices = @transform_4, window_bounds = array<i64: 8, 256>}]} {
    %c0 = arith.constant 0 : index
    %c0_0 = arith.constant 0 : index
    %0 = vector.load %arg1[%c0, %c0_0] : memref<8x256xf32, #tpu.memory_space<vmem>>, vector<8x256xf32>
    %c0_1 = arith.constant 0 : index
    %c0_2 = arith.constant 0 : index
    %1 = vector.load %arg4[%c0_1, %c0_2] : memref<4x256xf32, #tpu.memory_space<vmem>>, vector<1x256xf32>
    %c1 = arith.constant 1 : index
    %c0_3 = arith.constant 0 : index
    %2 = vector.load %arg4[%c1, %c0_3] : memref<4x256xf32, #tpu.memory_space<vmem>>, vector<1x256xf32>
    %c2 = arith.constant 2 : index
    %c0_4 = arith.constant 0 : index
    %3 = vector.load %arg4[%c2, %c0_4] : memref<4x256xf32, #tpu.memory_space<vmem>>, vector<1x256xf32>
    %c3 = arith.constant 3 : index
    %c0_5 = arith.constant 0 : index
    %4 = vector.load %arg4[%c3, %c0_5] : memref<4x256xf32, #tpu.memory_space<vmem>>, vector<1x256xf32>
    %c16_i32 = arith.constant 16 : i32
    %5 = tpu.dynamic_rotate %0 by %c16_i32 dim 1 : vector<8x256xf32>, i32 -> vector<8x256xf32>
    %6 = vector.broadcast %1 : vector<1x256xf32> to vector<8x256xf32>
    %7 = arith.mulf %5, %6 : vector<8x256xf32>
    %c240_i32 = arith.constant 240 : i32
    %8 = tpu.dynamic_rotate %0 by %c240_i32 dim 1 : vector<8x256xf32>, i32 -> vector<8x256xf32>
    %9 = vector.broadcast %2 : vector<1x256xf32> to vector<8x256xf32>
    %10 = arith.mulf %8, %9 : vector<8x256xf32>
    %c0_6 = arith.constant 0 : index
    %c0_7 = arith.constant 0 : index
    %11 = vector.load %arg2[%c0_6, %c0_7] : memref<8x9xf32, #tpu.memory_space<vmem>>, vector<8x1xf32>
    %12 = vector.broadcast %11 : vector<8x1xf32> to vector<8x256xf32>
    %13 = arith.mulf %12, %7 : vector<8x256xf32>
    %c0_8 = arith.constant 0 : index
    %c3_9 = arith.constant 3 : index
    %14 = vector.load %arg2[%c0_8, %c3_9] : memref<8x9xf32, #tpu.memory_space<vmem>>, vector<8x1xf32>
    %15 = vector.broadcast %14 : vector<8x1xf32> to vector<8x256xf32>
    %16 = arith.mulf %15, %0 : vector<8x256xf32>
    %17 = arith.addf %13, %16 : vector<8x256xf32>
    %c0_10 = arith.constant 0 : index
    %c6 = arith.constant 6 : index
    %18 = vector.load %arg2[%c0_10, %c6] : memref<8x9xf32, #tpu.memory_space<vmem>>, vector<8x1xf32>
    %19 = vector.broadcast %18 : vector<8x1xf32> to vector<8x256xf32>
    %20 = arith.mulf %19, %10 : vector<8x256xf32>
    %21 = arith.addf %17, %20 : vector<8x256xf32>
    %c0_11 = arith.constant 0 : index
    %c1_12 = arith.constant 1 : index
    %22 = vector.load %arg2[%c0_11, %c1_12] : memref<8x9xf32, #tpu.memory_space<vmem>>, vector<8x1xf32>
    %23 = vector.broadcast %22 : vector<8x1xf32> to vector<8x256xf32>
    %24 = arith.mulf %23, %7 : vector<8x256xf32>
    %c0_13 = arith.constant 0 : index
    %c4 = arith.constant 4 : index
    %25 = vector.load %arg2[%c0_13, %c4] : memref<8x9xf32, #tpu.memory_space<vmem>>, vector<8x1xf32>
    %26 = vector.broadcast %25 : vector<8x1xf32> to vector<8x256xf32>
    %27 = arith.mulf %26, %0 : vector<8x256xf32>
    %28 = arith.addf %24, %27 : vector<8x256xf32>
    %c0_14 = arith.constant 0 : index
    %c7 = arith.constant 7 : index
    %29 = vector.load %arg2[%c0_14, %c7] : memref<8x9xf32, #tpu.memory_space<vmem>>, vector<8x1xf32>
    %30 = vector.broadcast %29 : vector<8x1xf32> to vector<8x256xf32>
    %31 = arith.mulf %30, %10 : vector<8x256xf32>
    %32 = arith.addf %28, %31 : vector<8x256xf32>
    %c0_15 = arith.constant 0 : index
    %c2_16 = arith.constant 2 : index
    %33 = vector.load %arg2[%c0_15, %c2_16] : memref<8x9xf32, #tpu.memory_space<vmem>>, vector<8x1xf32>
    %34 = vector.broadcast %33 : vector<8x1xf32> to vector<8x256xf32>
    %35 = arith.mulf %34, %7 : vector<8x256xf32>
    %c0_17 = arith.constant 0 : index
    %c5 = arith.constant 5 : index
    %36 = vector.load %arg2[%c0_17, %c5] : memref<8x9xf32, #tpu.memory_space<vmem>>, vector<8x1xf32>
    %37 = vector.broadcast %36 : vector<8x1xf32> to vector<8x256xf32>
    %38 = arith.mulf %37, %0 : vector<8x256xf32>
    %39 = arith.addf %35, %38 : vector<8x256xf32>
    %c0_18 = arith.constant 0 : index
    %c8 = arith.constant 8 : index
    %40 = vector.load %arg2[%c0_18, %c8] : memref<8x9xf32, #tpu.memory_space<vmem>>, vector<8x1xf32>
    %41 = vector.broadcast %40 : vector<8x1xf32> to vector<8x256xf32>
    %42 = arith.mulf %41, %10 : vector<8x256xf32>
    %43 = arith.addf %39, %42 : vector<8x256xf32>
    %c0_19 = arith.constant 0 : index
    %c0_20 = arith.constant 0 : index
    %44 = vector.load %arg3[%c0_19, %c0_20] : memref<8x1xf32, #tpu.memory_space<vmem>>, vector<8x1xf32>
    %45 = vector.broadcast %44 : vector<8x1xf32> to vector<8x256xf32>
    %46 = arith.addf %45, %32 : vector<8x256xf32>
    %c1_i32 = arith.constant 1 : i32
    %47 = tpu.dynamic_rotate %21 by %c1_i32 dim 1 : vector<8x256xf32>, i32 -> vector<8x256xf32>
    %48 = vector.broadcast %3 : vector<1x256xf32> to vector<8x256xf32>
    %49 = arith.mulf %48, %47 : vector<8x256xf32>
    %50 = arith.addf %46, %49 : vector<8x256xf32>
    %c255_i32 = arith.constant 255 : i32
    %51 = tpu.dynamic_rotate %43 by %c255_i32 dim 1 : vector<8x256xf32>, i32 -> vector<8x256xf32>
    %52 = vector.broadcast %4 : vector<1x256xf32> to vector<8x256xf32>
    %53 = arith.mulf %52, %51 : vector<8x256xf32>
    %54 = arith.addf %50, %53 : vector<8x256xf32>
    %c0_21 = arith.constant 0 : index
    %c0_22 = arith.constant 0 : index
    %55 = vector.load %arg5[%c0_21, %c0_22] : memref<8x256xf32, #tpu.memory_space<vmem>>, vector<8x256xf32>
    tpu.vector_store %arg5[%c0_21, %c0_22], %54 {strides = array<i32>} : memref<8x256xf32, #tpu.memory_space<vmem>>, vector<8x256xf32>,
    return
  }
  func.func @transform_0(%arg0: i32) -> (i32, i32) {
    %c0_i32 = arith.constant 0 : i32
    %c0_i32_0 = arith.constant 0 : i32
    return %arg0, %c0_i32 : i32, i32
  }
  func.func @transform_1(%arg0: i32) -> (i32, i32) {
    %c0_i32 = arith.constant 0 : i32
    %c0_i32_0 = arith.constant 0 : i32
    return %arg0, %c0_i32 : i32, i32
  }
  func.func @transform_2(%arg0: i32) -> (i32, i32) {
    %c0_i32 = arith.constant 0 : i32
    %c0_i32_0 = arith.constant 0 : i32
    return %arg0, %c0_i32 : i32, i32
  }
  func.func @transform_3(%arg0: i32) -> (i32, i32) {
    %c0_i32 = arith.constant 0 : i32
    %c0_i32_0 = arith.constant 0 : i32
    %c0_i32_1 = arith.constant 0 : i32
    return %c0_i32, %c0_i32_0 : i32, i32
  }
  func.func @transform_4(%arg0: i32) -> (i32, i32) {
    %c0_i32 = arith.constant 0 : i32
    %c0_i32_0 = arith.constant 0 : i32
    return %arg0, %c0_i32 : i32, i32
  }
}

</mosaic_0001>

<bundles_post_ra>
// kernel: tpu_custom_call.1
= control target key start
LH: loop header
LB: loop body
LE: loop exit
PB: predicated region body
PF: predicated region fallthrough
CT: control target
= control target key end

     0   :  { %9 = vsyncpa [#allocation3], 0  ;;  %s408_s0 = inlined_call_operand.hbm [shape: f32[8,256], index: 0, kind: input, shape index: {}]   ;;  %s409_s1 = inlined_call_operand.vmem [shape: f32[8,9], index: 1, kind: input, shape index: {}]   ;;  %s410_s2 = inlined_call_operand.vmem [shape: f32[8,1], index: 2, kind: input, shape index: {}]   ;;  %s411_s3 = inlined_call_operand.vmem [shape: f32[4,256], index: 3, kind: input, shape index: {}]   ;;  %s412_s4 = inlined_call_operand.hbm [shape: f32[8,256], index: 4, kind: output, shape index: {}]  }
   0x1   :  { %10 = vsyncpa [#allocation4], 0  ;;  %s294_s15 = smov [#allocation2]   ;;  %s246_s19 = scalar_lea.hbm %s408_s0, 256 }
   0x2   :  { %s17_s16 = sshll.u32 %s294_s15, 4  ;;  %p247_p0 = scmp.ne.s32.totalorder %s408_s0, %s246_s19  ;;  %s18_s16 = int_to_ptr.vmem [resolvable:$true] %s17_s16 }
   0x3   :  { %p250_p1 = scmp.lt.u32.totalorder %s246_s19, %s408_s0 }
   0x5   :  { %p252_p2 = pnand %p250_p1, %p247_p0 }
   0x7   :  { %255 = shalt.err (!%p252_p2)
}
   0x8   :  { %s256_s24 = scalar_lea.vmem %s18_s16, 256  ;;  %p261_p4 = scmp.lt.s32.totalorder %s18_s16, %s18_s16 }
   0x9   :  { %p257_p3 = scmp.ne.s32.totalorder %s18_s16, %s256_s24  ;;  %p262_p5 = scmp.lt.s32.totalorder %s256_s24, %s256_s24 }
   0xb   :  { %p263_p6 = por %p262_p5, %p261_p4 }
   0xd   :  { %p264_p7 = pnand %p263_p6, %p257_p3 }
   0xf   :  { %267 = shalt.err (!%p264_p7)
}
  0x10   :  { %20 = dma.hbm_to_vmem [thread:$0]  %s408_s0, 256, %s18_s16, [#allocation3]  }
  0x11   :  { %290 = dma.done.wait [#allocation3], 256  }
  0x12   :  { %291 = vsyncadd [#allocation3], 4294967040  ;;  %v295_v0 = vmov 6   ;;  %v296_v1 = vmov 0   ;;  %v81_v2 = vld [vmem:[%s409_s1] sm:$0xff]  ;;  %v297_v3 = vmov 2   ;;  %v43_v15 = vlaneseq }
  0x13   :  { %238 = vset.pattern.permute.xlu1 %v295_v0  ;;  %236 = vset.pattern.permute.xlu0 %v296_v1  ;;  %v298_v4 = vmov 3   ;;  %v349_v5 = vld [vmem:[#allocation2] sm:$0xff]  ;;  %v299_v6 = vmov 5   ;;  %s300_s0 = smov 16   ;;  %v301_v7 = vmov 8   ;;  %v352_v8 = vld [vmem:[#allocation2 + $0x8] sm:$0xff] }
  0x14   :  { %98 = vperm.xlu1 %238, %v81_v2   ;;  %84 = vperm.xlu0 %236, %v81_v2   ;;  %v302_v9 = vmov 4   ;;  %v303_v10 = vmov 1   ;;  %s304_s1 = smov 112   ;;  %v149_v11 = vld [vmem:[%s410_s2] sm:$0xff]  ;;  %v305_v12 = vmov 7   ;;  %v50_v17 = vshrl.u32 %v43_v15, 7 }
  0x15   :  { %v360_v19 = vand.u32 127, %v43_v15  ;;  %v32_v22 = vld [vmem:[%s411_s3] ss:$4 sm:$0x3]  ;;  %s306_s8 = smov 127   ;;  %s307_s9 = smov 1  }
  0x16   :  { %v362_v21 = vsub.s32 0, %v50_v17  ;;  %v368_v23 = vsub.s32 1, %v50_v17  ;;  %v218_v29 = vld [vmem:[%s411_s3 + $0x1] ss:$4 sm:$0x3]  ;;  %s308_s14 = smov [#allocation5]  }
  0x17   :  { %vm45_vm0 = vcmp.lt.s32.totalorder %v360_v19, 16  ;;  %vm65_vm1 = vcmp.lt.s32.totalorder %v360_v19, 112  ;;  %vm161_vm2 = vcmp.lt.s32.totalorder %v360_v19, 1  ;;  %v220_v15 = vld [vmem:[%s411_s3 + $0x3] ss:$4 sm:$0x3] }
  0x18   :  { %239 = vset.pattern.permute.xlu1 %v297_v3  ;;  %237 = vset.pattern.permute.xlu0 %v298_v4  ;;  %v52_v25 = vrot.slane %v32_v22, %v362_v21  ;;  %v56_v28 = vrot.slane %v32_v22, %v368_v23  ;;  %v72_v33 = vrot.slane %v218_v29, %v362_v21  ;;  %vm183_vm3 = vcmp.lt.s32.totalorder %v360_v19, 127 }
  0x19   :  { %128 = vperm.xlu1 %239, %v81_v2   ;;  %90 = vperm.xlu0 %237, %v81_v2   ;;  %v76_v34 = vrot.slane %v218_v29, %v368_v23 }
  0x1d   :  { %240 = vset.pattern.permute.xlu1 %v299_v6  ;;  %39 = vrot.lane.b32.xlu0 %v349_v5, %s300_s0 }
  0x1e   :  { %134 = vperm.xlu1 %240, %v81_v2   ;;  %241 = vset.pattern.permute.xlu0 %v301_v7 }
  0x21   :  { %142 = vperm.xlu0 %241, %v81_v2  }
  0x22   :  { %41 = vrot.lane.b32.xlu1 %v352_v8, %s300_s0 }
  0x23   :  { %243 = vset.pattern.permute.xlu1 %v302_v9 }
  0x25   :  { %242 = vset.pattern.permute.xlu0 %v303_v10 }
  0x26   :  { %61 = vrot.lane.b32.xlu1 %v349_v5, %s304_s1  ;;  %106 = vperm.xlu0 %242, %v81_v2  }
  0x2a   :  { %63 = vrot.lane.b32.xlu1 %v352_v8, %s304_s1  ;;  %245 = vset.pattern.permute.xlu0 %v296_v1 }
  0x2b   :  { %152 = vperm.xlu0 %245, %v149_v11  }
  0x2e   :  { %112 = vperm.xlu1 %243, %v81_v2  }
  0x32   :  { %244 = vset.pattern.permute.xlu1 %v305_v12  ;;  %v219_v12 = vld [vmem:[%s411_s3 + $0x2] ss:$4 sm:$0x3]  ;;  %s209_s3 = sshll.u32 %s308_s14, 4  ;;  %s210_s3 = int_to_ptr.vmem [resolvable:$true] %s209_s3 }
  0x33   :  { %120 = vperm.xlu1 %244, %v81_v2   ;;  %s268_s15 = scalar_lea.vmem %s210_s3, 256  ;;  %p273_p9 = scmp.lt.s32.totalorder %s210_s3, %s210_s3 }
  0x34   :  { %p269_p8 = scmp.ne.s32.totalorder %s210_s3, %s268_s15  ;;  %p274_p10 = scmp.lt.s32.totalorder %s268_s15, %s268_s15 }
  0x36   :  { %p275_p11 = por %p274_p10, %p273_p9 }
  0x38   :  { %p276_p12 = pnand %p275_p11, %p269_p8 }
  0x93   :  { %v99_v13 = vpop.permute.xlu1 %98  ;;  %v85_v14 = vpop.permute.xlu0 %84 }
  0x98   :  { %v129_v16 = vpop.permute.xlu1 %128  ;;  %v91_v18 = vpop.permute.xlu0 %90 }
  0x99   :  { %v93_v37 = vmul.f32 %v91_v18, %v349_v5  ;;  %v94_v46 = vmul.f32 %v91_v18, %v352_v8 }
  0x9c   :  { %v40_v24 = vpop.permute.xlu0 %39 }
  0x9d   :  { %v135_v20 = vpop.permute.xlu1 %134 }
  0x9e   :  { %v137_v43 = vmul.f32 %v135_v20, %v349_v5  ;;  %v138_v63 = vmul.f32 %v135_v20, %v352_v8 }
  0xa0   :  { %v143_v36 = vpop.permute.xlu0 %142 }
  0xa1   :  { %v42_v26 = vpop.permute.xlu1 %41 }
  0xa2   :  { %v47_v27 = vsel %vm45_vm0, %v42_v26, %v40_v24  ;;  %v46_v30 = vsel %vm45_vm0, %v40_v24, %v42_v26  ;;  %v194_v26 = vrot.slane %v220_v15, %v368_v23 }
  0xa3   :  { %v59_v31 = vmul.f32 %v52_v25, %v47_v27  ;;  %v60_v35 = vmul.f32 %v56_v28, %v46_v30  ;;  %v190_v25 = vrot.slane %v220_v15, %v362_v21 }
  0xa5   :  { %v62_v32 = vpop.permute.xlu1 %61  ;;  %v87_v38 = vmul.f32 %v85_v14, %v59_v31  ;;  %v131_v39 = vmul.f32 %v129_v16, %v59_v31  ;;  %v88_v47 = vmul.f32 %v85_v14, %v60_v35  ;;  %v107_v53 = vpop.permute.xlu0 %106  ;;  %v132_v60 = vmul.f32 %v129_v16, %v60_v35 }
  0xa6   :  { %v109_v61 = vmul.f32 %v107_v53, %v59_v31  ;;  %v110_v62 = vmul.f32 %v107_v53, %v60_v35  ;;  %v172_v14 = vrot.slane %v219_v12, %v368_v23 }
  0xa7   :  { %v139_v49 = vadd.f32 %v137_v43, %v131_v39  ;;  %v95_v51 = vadd.f32 %v93_v37, %v87_v38  ;;  %v96_v59 = vadd.f32 %v94_v46, %v88_v47  ;;  %v140_v10 = vadd.f32 %v138_v63, %v132_v60 }
  0xa9   :  { %v64_v40 = vpop.permute.xlu1 %63 }
  0xaa   :  { %v66_v41 = vsel %vm65_vm1, %v62_v32, %v64_v40  ;;  %v67_v42 = vsel %vm65_vm1, %v64_v40, %v62_v32  ;;  %v153_v16 = vpop.permute.xlu0 %152 }
  0xab   :  { %v79_v44 = vmul.f32 %v72_v33, %v66_v41  ;;  %v80_v45 = vmul.f32 %v76_v34, %v67_v42 }
  0xad   :  { %v113_v48 = vpop.permute.xlu1 %112  ;;  %v145_v50 = vmul.f32 %v143_v36, %v79_v44  ;;  %v101_v52 = vmul.f32 %v99_v13, %v79_v44  ;;  %v102_v54 = vmul.f32 %v99_v13, %v80_v45  ;;  %v146_v2 = vmul.f32 %v143_v36, %v80_v45 }
  0xae   :  { %v115_v55 = vmul.f32 %v113_v48, %v349_v5  ;;  %v116_v56 = vmul.f32 %v113_v48, %v352_v8  ;;  %v168_v8 = vrot.slane %v219_v12, %v362_v21 }
  0xaf   :  { %v147_v57 = vadd.f32 %v145_v50, %v139_v49  ;;  %v103_v58 = vadd.f32 %v101_v52, %v95_v51  ;;  %v104_v1 = vadd.f32 %v102_v54, %v96_v59  ;;  %v148_v11 = vadd.f32 %v146_v2, %v140_v10 }
  0xb0   :  { %v117_v3 = vadd.f32 %v115_v55, %v109_v61  ;;  %v118_v4 = vadd.f32 %v116_v56, %v110_v62 }
  0xb1   :  { %179 = vrot.lane.b32.xlu0 %v147_v57, %s306_s8  ;;  %157 = vrot.lane.b32.xlu1 %v103_v58, %s307_s9 }
  0xb2   :  { %v121_v0 = vpop.permute.xlu1 %120 }
  0xb3   :  { %v123_v5 = vmul.f32 %v121_v0, %v79_v44  ;;  %v124_v6 = vmul.f32 %v121_v0, %v80_v45 }
  0xb5   :  { %159 = vrot.lane.b32.xlu1 %v104_v1, %s307_s9  ;;  %v125_v7 = vadd.f32 %v123_v5, %v117_v3  ;;  %v126_v9 = vadd.f32 %v124_v6, %v118_v4 }
  0xb7   :  { %v155_v27 = vadd.f32 %v153_v16, %v125_v7  ;;  %v156_v28 = vadd.f32 %v153_v16, %v126_v9 }
  0xb9   :  { %181 = vrot.lane.b32.xlu1 %v148_v11, %s306_s8 }
 0x123   :  { %v158_v13 = vpop.permute.xlu1 %157  ;;  %v180_v29 = vpop.permute.xlu0 %179 }
 0x127   :  { %v160_v17 = vpop.permute.xlu1 %159 }
 0x128   :  { %v162_v18 = vsel %vm161_vm2, %v158_v13, %v160_v17  ;;  %v163_v20 = vsel %vm161_vm2, %v160_v17, %v158_v13 }
 0x129   :  { %v175_v22 = vmul.f32 %v168_v8, %v163_v20  ;;  %v176_v24 = vmul.f32 %v172_v14, %v162_v18 }
 0x12b   :  { %v182_v30 = vpop.permute.xlu1 %181  ;;  %v177_v33 = vadd.f32 %v175_v22, %v155_v27  ;;  %v178_v34 = vadd.f32 %v176_v24, %v156_v28 }
 0x12c   :  { %v184_v31 = vsel %vm183_vm3, %v180_v29, %v182_v30  ;;  %v185_v32 = vsel %vm183_vm3, %v182_v30, %v180_v29 }
 0x12d   :  { %v197_v35 = vmul.f32 %v190_v25, %v184_v31  ;;  %v198_v36 = vmul.f32 %v194_v26, %v185_v32 }
 0x12f   :  { %v199_v37 = vadd.f32 %v197_v35, %v177_v33  ;;  %v200_v19 = vadd.f32 %v198_v36, %v178_v34 }
 0x131   :  { %201 = vst [vmem:[#allocation5] sm:$0xff] %v199_v37  ;;  %202 = vst [vmem:[#allocation5 + $0x8] sm:$0xff] %v200_v19 }
 0x132   :  { %279 = shalt.err (!%p276_p12)
}
 0x133   :  { %s280_s18 = scalar_lea.hbm %s412_s4, 256 }
 0x134   :  { %p281_p13 = scmp.ne.s32.totalorder %s412_s4, %s280_s18  ;;  %p284_p0 = scmp.lt.u32.totalorder %s280_s18, %s412_s4 }
 0x136   :  { %p286_p1 = pnand %p284_p0, %p281_p13 }
 0x138   :  { %289 = shalt.err (!%p286_p1)
}
 0x139   :  { %212 = dma.vmem_to_hbm [thread:$0]  %s210_s3, 256, %s412_s4, [#allocation4]  }
 0x13a   :  { %292 = dma.done.wait [#allocation4], 256  }
 0x13b   :  { %293 = vsyncadd [#allocation4], 4294967040 }
 0x13c   :  { %216 = vsyncpa [#allocation3], 1 }
 0x13d   :  { %217 = vsyncpa [#allocation4], 1 }

</bundles_post_ra>
